<compile_context>
chip_gen: v5e
topology: v5e:2x2
jax: 0.10.0
libtpu: 0.0.40
codegen_flags: <defaults>
</compile_context>

<pallas_src>
import jax
import jax.numpy as jnp
from jax.experimental import pallas as pl
from jax.experimental.pallas import tpu as pltpu


def _cdiv(a, b):
    return -(-a // b)


def _round_up(v, m):
    return _cdiv(v, m) * m


def _mlp_kernel(x_ref, w1_ref, b1_ref, w2_ref, b2_ref, o_ref):
    """Fused Linear -> ReLU -> Linear for one batch tile."""
    # Cast activations to the MXU operand dtype in-kernel (no wrapper HBM pass).
    x = x_ref[...].astype(w1_ref.dtype)
    # First projection (MXU, f32 accumulate) + bias + ReLU in f32 (VPU).
    h = jnp.dot(x, w1_ref[...], preferred_element_type=jnp.float32)
    h = jnp.maximum(h + b1_ref[...], 0.0)
    # Second projection (MXU, f32 accumulate) + bias in f32.
    out = jnp.dot(h.astype(w2_ref.dtype), w2_ref[...],
                  preferred_element_type=jnp.float32)
    o_ref[...] = (out + b2_ref[...]).astype(o_ref.dtype)


def prepare_params(w1, b1, w2, b2, *, use_bf16=True):
    """One-time parameter preparation (hoisted out of the per-call path).

    Casts the weight matrices to the MXU compute dtype (bf16 by default for
    v5e/v6e/v7x MXU throughput) and keeps biases in f32 for the epilogue.
    """
    cdt = jnp.bfloat16 if use_bf16 else jnp.float32
    w1c = jnp.asarray(w1, cdt)
    w2c = jnp.asarray(w2, cdt)
    b1c = jnp.reshape(jnp.asarray(b1, jnp.float32), (1, w1c.shape[1]))
    b2c = jnp.reshape(jnp.asarray(b2, jnp.float32), (1, w2c.shape[1]))
    return w1c, b1c, w2c, b2c


def _vmem_cap_bytes():
    """75% of the per-TC physical VMEM (headroom for Mosaic internal scratch)."""
    try:
        phys = int(pltpu.get_tpu_info().vmem_capacity_bytes)
    except Exception:
        phys = 64 * 2 ** 20  # conservative (v7x per-TC)
    return int(phys * 3 // 4)


def _make_specs(tb_eff, d_in, hid, d_out, weight_pipeline_mode):
    wkw = {}
    if weight_pipeline_mode is not None:
        wkw["pipeline_mode"] = weight_pipeline_mode
    in_specs = [
        pl.BlockSpec((tb_eff, d_in), lambda i: (i, 0)),          # x tile (pipelined)
        pl.BlockSpec((d_in, hid), lambda i: (0, 0), **wkw),      # w1 (resident)
        pl.BlockSpec((1, hid), lambda i: (0, 0), **wkw),         # b1
        pl.BlockSpec((hid, d_out), lambda i: (0, 0), **wkw),     # w2 (resident)
        pl.BlockSpec((1, d_out), lambda i: (0, 0), **wkw),       # b2
    ]
    out_specs = pl.BlockSpec((tb_eff, d_out), lambda i: (i, 0))
    return in_specs, out_specs


def embedding_forward(x, w1, b1, w2, b2, *, tb=512):
    """Pallas implementation of EmbeddingModule.forward.

    x  : [B, input_dim] (f32)
    w1 : [input_dim, hidden_dim]  (compute dtype), b1 : [1, hidden_dim]  (f32)
    w2 : [hidden_dim, memory_dim] (compute dtype), b2 : [1, memory_dim]  (f32)
    returns [B, memory_dim] in x.dtype
    """
    B, d_in = x.shape
    hid = w1.shape[1]
    d_out = w2.shape[1]
    out_dtype = x.dtype
    cdt = w1.dtype
    w_item = jnp.dtype(cdt).itemsize

    # ---- batch tiling: cdiv-first, >= 4 blocks when the batch allows it ----
    sub = 16 if w_item == 2 else 8            # bf16 packs 2 rows / sublane
    max_blocks = max(1, _cdiv(B, sub))
    grid_n = max(_cdiv(B, tb), min(4, max_blocks))
    tb_eff = _round_up(_cdiv(B, grid_n), sub)
    grid_n = _cdiv(B, tb_eff)
    B_p = grid_n * tb_eff

    x_in = x if B_p == B else jnp.zeros((B_p, d_in), x.dtype).at[:B].set(x)

    # ---- VMEM budget (includes f32 intermediates), generation-aware cap ----
    lane = lambda n: _round_up(n, 128)
    slab = lambda n: _round_up(n, 8)
    vmem_bytes = (
        2 * tb_eff * lane(d_in) * 4                                   # x tiles (dbl-buffered, f32)
        + 2 * tb_eff * lane(d_out) * 4                                # out tiles (dbl-buffered, f32)
        + 2 * (slab(d_in) * lane(hid) + slab(hid) * lane(d_out)) * w_item   # weights (upper bound)
        + 4 * 8 * (lane(hid) + lane(d_out)) * 4                       # biases
        + tb_eff * lane(d_in) * w_item                                # in-kernel x cast
        + tb_eff * lane(hid) * (4 + w_item)                           # f32 hidden + cast copy
        + tb_eff * lane(d_out) * 4                                    # f32 pre-cast output
        + (2 << 20)                                                   # Mosaic scratch slack
    )
    vmem_bytes = int(min(_vmem_cap_bytes(), max(vmem_bytes, 4 * 2 ** 20)))

    # ---- cost estimate so XLA schedules surrounding ops sensibly ----
    cost = pl.CostEstimate(
        flops=2 * B_p * (d_in * hid + hid * d_out),
        transcendentals=0,
        bytes_accessed=(B_p * d_in * 4 + B_p * d_out * 4
                        + (d_in * hid + hid * d_out) * w_item
                        + (hid + d_out) * 4),
    )

    def _call(weight_pipeline_mode):
        in_specs, out_specs = _make_specs(tb_eff, d_in, hid, d_out,
                                          weight_pipeline_mode)
        return pl.pallas_call(
            _mlp_kernel,
            out_shape=jax.ShapeDtypeStruct((B_p, d_out), out_dtype),
            grid_spec=pltpu.PrefetchScalarGridSpec(
                num_scalar_prefetch=0,
                grid=(grid_n,),
                in_specs=in_specs,
                out_specs=out_specs,
            ),
            compiler_params=pltpu.CompilerParams(
                dimension_semantics=("parallel",),
                vmem_limit_bytes=vmem_bytes,
            ),
            cost_estimate=cost,
        )(x_in, w1, b1, w2, b2)

    try:
        # Grid-invariant operands only need a single VMEM buffer.
        out_p = _call(pl.Buffered(1))
    except Exception:
        # Fallback: default (double) buffering; tiny extra VMEM for these dims.
        out_p = _call(None)

    return out_p if B_p == B else out_p[:B]


def init_params(key, input_dim, memory_dim, dtype=jnp.float32):
    """PyTorch nn.Linear-style init: U[-1/sqrt(fan_in), 1/sqrt(fan_in)]."""
    hidden_dim = (input_dim + memory_dim) // 2
    k1, k2, k3, k4 = jax.random.split(key, 4)
    bound1 = 1.0 / (input_dim ** 0.5)
    bound2 = 1.0 / (hidden_dim ** 0.5)
    w1 = jax.random.uniform(k1, (input_dim, hidden_dim), dtype, -bound1, bound1)
    b1 = jax.random.uniform(k2, (1, hidden_dim), dtype, -bound1, bound1)
    w2 = jax.random.uniform(k3, (hidden_dim, memory_dim), dtype, -bound2, bound2)
    b2 = jax.random.uniform(k4, (1, memory_dim), dtype, -bound2, bound2)
    return w1, b1, w2, b2


def _ref(x, w1, b1, w2, b2):
    return jnp.maximum(x @ w1 + b1, 0.0) @ w2 + b2


if __name__ == "__main__":
    input_dim = 32
    memory_dim = 16
    batch = 8

    key = jax.random.PRNGKey(0)
    kx, kb, kp = jax.random.split(key, 3)
    x = jax.random.normal(kx, (batch, input_dim), jnp.float32)
    w1, b1, w2, b2 = init_params(kp, input_dim, memory_dim)
    ref = _ref(x, w1, b1, w2, b2)

    # --- exact f32 operand path ---
    p32 = prepare_params(w1, b1, w2, b2, use_bf16=False)
    out = jax.block_until_ready(embedding_forward(x, *p32))
    assert out.shape == (batch, memory_dim)
    assert jnp.allclose(out, ref, atol=1e-5, rtol=1e-5)

    # --- ragged (non-tile-multiple) batch goes through the padding path ---
    x_odd = x[:5]
    out_odd = jax.block_until_ready(embedding_forward(x_odd, *p32))
    assert out_odd.shape == (5, memory_dim)
    assert jnp.allclose(out_odd, _ref(x_odd, w1, b1, w2, b2), atol=1e-5, rtol=1e-5)

    # --- larger batch: exercises the multi-block (megacore-parallel) grid ---
    x_big = jax.random.normal(kb, (200, input_dim), jnp.float32)
    out_big = jax.block_until_ready(embedding_forward(x_big, *p32))
    assert out_big.shape == (200, memory_dim)
    assert jnp.allclose(out_big, _ref(x_big, w1, b1, w2, b2), atol=1e-5, rtol=1e-5)

    # --- default bf16 MXU-operand path (f32 accumulate), looser tolerance ---
    pbf = prepare_params(w1, b1, w2, b2)  # bf16 by default
    out_bf = jax.block_until_ready(embedding_forward(x, *pbf))
    assert out_bf.shape == (batch, memory_dim)
    assert jnp.allclose(out_bf, ref, atol=3e-2, rtol=3e-2)

    out_big_bf = jax.block_until_ready(embedding_forward(x_big, *pbf))
    assert jnp.allclose(out_big_bf, _ref(x_big, w1, b1, w2, b2), atol=3e-2, rtol=3e-2)

    print("KERNEL_OK")
</pallas_src>

<mosaic_0001>
module attributes {stable_mosaic.version = 11 : i64} {
  func.func @_mlp_kernel(%arg0: i32, %arg1: memref<8x32xf32, #tpu.memory_space<vmem>>, %arg2: memref<32x24xf32, #tpu.memory_space<vmem>>, %arg3: memref<1x24xf32, #tpu.memory_space<vmem>>, %arg4: memref<24x16xf32, #tpu.memory_space<vmem>>, %arg5: memref<1x16xf32, #tpu.memory_space<vmem>>, %arg6: memref<8x16xf32, #tpu.memory_space<vmem>>) attributes {dimension_semantics = [#tpu.dimension_semantics<parallel>], iteration_bounds = array<i64: 1>, scalar_prefetch = 0 : i64, scratch_operands = 0 : i64, tpu.core_type = #tpu.core_type<tc>, window_params = [{transform_indices = @transform_0, window_bounds = array<i64: 8, 32>}, {pipeline_mode = #tpu.pipeline_mode<synchronous>, transform_indices = @transform_1, window_bounds = array<i64: 32, 24>}, {pipeline_mode = #tpu.pipeline_mode<synchronous>, transform_indices = @transform_2, window_bounds = array<i64: 1, 24>}, {pipeline_mode = #tpu.pipeline_mode<synchronous>, transform_indices = @transform_3, window_bounds = array<i64: 24, 16>}, {pipeline_mode = #tpu.pipeline_mode<synchronous>, transform_indices = @transform_4, window_bounds = array<i64: 1, 16>}, {transform_indices = @transform_5, window_bounds = array<i64: 8, 16>}]} {
    %c0 = arith.constant 0 : index
    %c0_0 = arith.constant 0 : index
    %0 = vector.load %arg1[%c0, %c0_0] : memref<8x32xf32, #tpu.memory_space<vmem>>, vector<8x32xf32>
    %c0_1 = arith.constant 0 : index
    %c0_2 = arith.constant 0 : index
    %1 = vector.load %arg2[%c0_1, %c0_2] : memref<32x24xf32, #tpu.memory_space<vmem>>, vector<32x24xf32>
    %cst = arith.constant dense<0.000000e+00> : vector<8x24xf32>
    %2 = tpu.matmul %0, %1, %cst {dimension_numbers = #tpu.dot_dimension_numbers<[1], [0], [0], [1], [0, 0, 1, 1], [], []>} : vector<8x32xf32>, vector<32x24xf32>, vector<8x24xf32> -> vector<8x24xf32>
    %c0_3 = arith.constant 0 : index
    %c0_4 = arith.constant 0 : index
    %3 = vector.load %arg3[%c0_3, %c0_4] : memref<1x24xf32, #tpu.memory_space<vmem>>, vector<1x24xf32>
    %4 = vector.broadcast %3 : vector<1x24xf32> to vector<8x24xf32>
    %5 = arith.addf %2, %4 : vector<8x24xf32>
    %cst_5 = arith.constant 0.000000e+00 : f32
    %6 = vector.broadcast %cst_5 : f32 to vector<8x24xf32>
    %7 = arith.maximumf %5, %6 : vector<8x24xf32>
    %c0_6 = arith.constant 0 : index
    %c0_7 = arith.constant 0 : index
    %8 = vector.load %arg4[%c0_6, %c0_7] : memref<24x16xf32, #tpu.memory_space<vmem>>, vector<24x16xf32>
    %cst_8 = arith.constant dense<0.000000e+00> : vector<8x16xf32>
    %9 = tpu.matmul %7, %8, %cst_8 {dimension_numbers = #tpu.dot_dimension_numbers<[1], [0], [0], [1], [0, 0, 1, 1], [], []>} : vector<8x24xf32>, vector<24x16xf32>, vector<8x16xf32> -> vector<8x16xf32>
    %c0_9 = arith.constant 0 : index
    %c0_10 = arith.constant 0 : index
    %10 = vector.load %arg5[%c0_9, %c0_10] : memref<1x16xf32, #tpu.memory_space<vmem>>, vector<1x16xf32>
    %11 = vector.broadcast %10 : vector<1x16xf32> to vector<8x16xf32>
    %12 = arith.addf %9, %11 : vector<8x16xf32>
    %c0_11 = arith.constant 0 : index
    %c0_12 = arith.constant 0 : index
    %13 = vector.load %arg6[%c0_11, %c0_12] : memref<8x16xf32, #tpu.memory_space<vmem>>, vector<8x16xf32>
    tpu.vector_store %arg6[%c0_11, %c0_12], %12 {strides = array<i32>} : memref<8x16xf32, #tpu.memory_space<vmem>>, vector<8x16xf32>,
    return
  }
  func.func @transform_0(%arg0: i32) -> (i32, i32) {
    %c0_i32 = arith.constant 0 : i32
    %c0_i32_0 = arith.constant 0 : i32
    return %arg0, %c0_i32 : i32, i32
  }
  func.func @transform_1(%arg0: i32) -> (i32, i32) {
    %c0_i32 = arith.constant 0 : i32
    %c0_i32_0 = arith.constant 0 : i32
    %c0_i32_1 = arith.constant 0 : i32
    return %c0_i32, %c0_i32_0 : i32, i32
  }
  func.func @transform_2(%arg0: i32) -> (i32, i32) {
    %c0_i32 = arith.constant 0 : i32
    %c0_i32_0 = arith.constant 0 : i32
    %c0_i32_1 = arith.constant 0 : i32
    return %c0_i32, %c0_i32_0 : i32, i32
  }
  func.func @transform_3(%arg0: i32) -> (i32, i32) {
    %c0_i32 = arith.constant 0 : i32
    %c0_i32_0 = arith.constant 0 : i32
    %c0_i32_1 = arith.constant 0 : i32
    return %c0_i32, %c0_i32_0 : i32, i32
  }
  func.func @transform_4(%arg0: i32) -> (i32, i32) {
    %c0_i32 = arith.constant 0 : i32
    %c0_i32_0 = arith.constant 0 : i32
    %c0_i32_1 = arith.constant 0 : i32
    return %c0_i32, %c0_i32_0 : i32, i32
  }
  func.func @transform_5(%arg0: i32) -> (i32, i32) {
    %c0_i32 = arith.constant 0 : i32
    %c0_i32_0 = arith.constant 0 : i32
    return %arg0, %c0_i32 : i32, i32
  }
}

module attributes {stable_mosaic.version = 11 : i64} {
  func.func @_mlp_kernel(%arg0: i32, %arg1: memref<8x32xf32, #tpu.memory_space<vmem>>, %arg2: memref<32x24xf32, #tpu.memory_space<vmem>>, %arg3: memref<1x24xf32, #tpu.memory_space<vmem>>, %arg4: memref<24x16xf32, #tpu.memory_space<vmem>>, %arg5: memref<1x16xf32, #tpu.memory_space<vmem>>, %arg6: memref<8x16xf32, #tpu.memory_space<vmem>>) attributes {dimension_semantics = [#tpu.dimension_semantics<parallel>], iteration_bounds = array<i64: 1>, scalar_prefetch = 0 : i64, scratch_operands = 0 : i64, tpu.core_type = #tpu.core_type<tc>, window_params = [{transform_indices = @transform_0, window_bounds = array<i64: 8, 32>}, {pipeline_mode = #tpu.pipeline_mode<synchronous>, transform_indices = @transform_1, window_bounds = array<i64: 32, 24>}, {pipeline_mode = #tpu.pipeline_mode<synchronous>, transform_indices = @transform_2, window_bounds = array<i64: 1, 24>}, {pipeline_mode = #tpu.pipeline_mode<synchronous>, transform_indices = @transform_3, window_bounds = array<i64: 24, 16>}, {pipeline_mode = #tpu.pipeline_mode<synchronous>, transform_indices = @transform_4, window_bounds = array<i64: 1, 16>}, {transform_indices = @transform_5, window_bounds = array<i64: 8, 16>}]} {
    %c0 = arith.constant 0 : index
    %c0_0 = arith.constant 0 : index
    %0 = vector.load %arg1[%c0, %c0_0] : memref<8x32xf32, #tpu.memory_space<vmem>>, vector<8x32xf32>
    %c0_1 = arith.constant 0 : index
    %c0_2 = arith.constant 0 : index
    %1 = vector.load %arg2[%c0_1, %c0_2] : memref<32x24xf32, #tpu.memory_space<vmem>>, vector<32x24xf32>
    %cst = arith.constant dense<0.000000e+00> : vector<8x24xf32>
    %2 = tpu.matmul %0, %1, %cst {dimension_numbers = #tpu.dot_dimension_numbers<[1], [0], [0], [1], [0, 0, 1, 1], [], []>} : vector<8x32xf32>, vector<32x24xf32>, vector<8x24xf32> -> vector<8x24xf32>
    %c0_3 = arith.constant 0 : index
    %c0_4 = arith.constant 0 : index
    %3 = vector.load %arg3[%c0_3, %c0_4] : memref<1x24xf32, #tpu.memory_space<vmem>>, vector<1x24xf32>
    %4 = vector.broadcast %3 : vector<1x24xf32> to vector<8x24xf32>
    %5 = arith.addf %2, %4 : vector<8x24xf32>
    %cst_5 = arith.constant 0.000000e+00 : f32
    %6 = vector.broadcast %cst_5 : f32 to vector<8x24xf32>
    %7 = arith.maximumf %5, %6 : vector<8x24xf32>
    %c0_6 = arith.constant 0 : index
    %c0_7 = arith.constant 0 : index
    %8 = vector.load %arg4[%c0_6, %c0_7] : memref<24x16xf32, #tpu.memory_space<vmem>>, vector<24x16xf32>
    %cst_8 = arith.constant dense<0.000000e+00> : vector<8x16xf32>
    %9 = tpu.matmul %7, %8, %cst_8 {dimension_numbers = #tpu.dot_dimension_numbers<[1], [0], [0], [1], [0, 0, 1, 1], [], []>} : vector<8x24xf32>, vector<24x16xf32>, vector<8x16xf32> -> vector<8x16xf32>
    %c0_9 = arith.constant 0 : index
    %c0_10 = arith.constant 0 : index
    %10 = vector.load %arg5[%c0_9, %c0_10] : memref<1x16xf32, #tpu.memory_space<vmem>>, vector<1x16xf32>
    %11 = vector.broadcast %10 : vector<1x16xf32> to vector<8x16xf32>
    %12 = arith.addf %9, %11 : vector<8x16xf32>
    %c0_11 = arith.constant 0 : index
    %c0_12 = arith.constant 0 : index
    %13 = vector.load %arg6[%c0_11, %c0_12] : memref<8x16xf32, #tpu.memory_space<vmem>>, vector<8x16xf32>
    tpu.vector_store %arg6[%c0_11, %c0_12], %12 {strides = array<i32>} : memref<8x16xf32, #tpu.memory_space<vmem>>, vector<8x16xf32>,
    return
  }
  func.func @transform_0(%arg0: i32) -> (i32, i32) {
    %c0_i32 = arith.constant 0 : i32
    %c0_i32_0 = arith.constant 0 : i32
    return %arg0, %c0_i32 : i32, i32
  }
  func.func @transform_1(%arg0: i32) -> (i32, i32) {
    %c0_i32 = arith.constant 0 : i32
    %c0_i32_0 = arith.constant 0 : i32
    %c0_i32_1 = arith.constant 0 : i32
    return %c0_i32, %c0_i32_0 : i32, i32
  }
  func.func @transform_2(%arg0: i32) -> (i32, i32) {
    %c0_i32 = arith.constant 0 : i32
    %c0_i32_0 = arith.constant 0 : i32
    %c0_i32_1 = arith.constant 0 : i32
    return %c0_i32, %c0_i32_0 : i32, i32
  }
  func.func @transform_3(%arg0: i32) -> (i32, i32) {
    %c0_i32 = arith.constant 0 : i32
    %c0_i32_0 = arith.constant 0 : i32
    %c0_i32_1 = arith.constant 0 : i32
    return %c0_i32, %c0_i32_0 : i32, i32
  }
  func.func @transform_4(%arg0: i32) -> (i32, i32) {
    %c0_i32 = arith.constant 0 : i32
    %c0_i32_0 = arith.constant 0 : i32
    %c0_i32_1 = arith.constant 0 : i32
    return %c0_i32, %c0_i32_0 : i32, i32
  }
  func.func @transform_5(%arg0: i32) -> (i32, i32) {
    %c0_i32 = arith.constant 0 : i32
    %c0_i32_0 = arith.constant 0 : i32
    return %arg0, %c0_i32 : i32, i32
  }
}

</mosaic_0001>

<bundles_post_ra>
// kernel: tpu_custom_call.1
= control target key start
LH: loop header
LB: loop body
LE: loop exit
PB: predicated region body
PF: predicated region fallthrough
CT: control target
= control target key end

     0   :  { %s199_s0 = inlined_call_operand.vmem [shape: f32[8,32], index: 0, kind: input, shape index: {}]   ;;  %s200_s1 = inlined_call_operand.vmem [shape: f32[32,24], index: 1, kind: input, shape index: {}]   ;;  %s201_s2 = inlined_call_operand.vmem [shape: f32[1,24], index: 2, kind: input, shape index: {}]   ;;  %s202_s3 = inlined_call_operand.vmem [shape: f32[24,16], index: 3, kind: input, shape index: {}]   ;;  %s203_s4 = inlined_call_operand.vmem [shape: f32[1,16], index: 4, kind: input, shape index: {}]   ;;  %s204_s5 = inlined_call_operand.hbm [shape: f32[8,16], index: 5, kind: output, shape index: {}]  }
   0x1   :  { %v25_v0 = vld [vmem:[%s200_s1 + $0x18] sm:$0xff]  ;;  %v24_v1 = vld [vmem:[%s200_s1 + $0x10] sm:$0xff]  ;;  %v23_v2 = vld [vmem:[%s200_s1 + $0x8] sm:$0xff] }
   0x2   :  { %46 = vmatpush.msra.mxu0 %v25_v0 }
   0x3   :  { %10 = vsyncpa [#allocation3], 0  ;;  %v22_v3 = vld [vmem:[%s200_s1] sm:$0xff]  ;;  %vm30_vm0 = vcmask 261120   ;;  %v57_v5 = vld [vmem:[%s202_s3 + $0x10] sm:$0xff]  ;;  %vm62_vm1 = vcmask 195584  }
   0x4   :  { %47 = vmatpush.msra.mxu0 %v24_v1  ;;  %v21_v4 = vld [vmem:[%s199_s0] sm:$0xff]  ;;  %79 = vmatpush.msra.mxu1 %v57_v5  ;;  %v56_v6 = vld [vmem:[%s202_s3 + $0x8] sm:$0xff]  ;;  %s135_s11 = smov [#allocation2]   ;;  %vm86_vm2 = vcmask 130048  }
   0x5   :  { %v55_v7 = vld [vmem:[%s202_s3] sm:$0xff]  ;;  %s93_s12 = sshll.u32 %s135_s11, 4  ;;  %s95_s3 = sshll.u32 %s204_s5, 4  ;;  %s94_s12 = int_to_ptr.vmem [resolvable:$true] %s93_s12  ;;  %s96_s3 = int_to_ptr.hbm [resolvable:$true] %s95_s3 }
   0x6   :  { %48 = vmatpush.msra.mxu0 %v23_v2  ;;  %80 = vmatpush.msra.mxu1 %v56_v6  ;;  %v107_v8 = vld [vmem:[%s201_s2] ss:$0 sm:$0xff] }
   0x7   :  { %v108_v12 = vld [vmem:[%s203_s4] ss:$0 sm:$0xff] }
   0x8   :  { %49 = vmatpush.msra.mxu0 %v22_v3  ;;  %81 = vmatpush.msra.mxu1 %v55_v7 }
   0x9   :  { %104 = vmatmul.msk.f32.vlgmr.msra.gmra.mxu0 %vm30_vm0, %v21_v4 }
  0x86   :  { %v51_v9 = vpop.f32.mrf.mxu0 }
  0x87   :  { %v52_v10 = vadd.f32 %v107_v8, %v51_v9 }
  0x89   :  { %v54_v11 = vmax.f32 %v52_v10, 0.0 }
  0x8b   :  { %105 = vmatmul.msk.f32.vlgmr.msra.gmra.mxu1 %vm62_vm1, %v54_v11 }
 0x108   :  { %v83_v13 = vpop.f32.mrf.mxu1 }
 0x109   :  { %v84_v14 = vadd.f32 %v108_v12, %v83_v13 }
 0x10b   :  { %87 = vst.msk [vmem:[#allocation2] sm:$0xff] %vm86_vm2, %v84_v14 }
 0x10c   :  { %98 = dma.vmem_to_hbm [thread:$0]  %s94_s12, 128, %s96_s3, [#allocation3]  }
 0x10d   :  { %133 = dma.done.wait [#allocation3], 128  }
 0x10e   :  { %134 = vsyncadd [#allocation3], 4294967168 }
 0x10f   :  { %103 = vsyncpa [#allocation3], 1 }

// kernel: tpu_custom_call.1
= control target key start
LH: loop header
LB: loop body
LE: loop exit
PB: predicated region body
PF: predicated region fallthrough
CT: control target
= control target key end

     0   :  { %s199_s0 = inlined_call_operand.vmem [shape: f32[8,32], index: 0, kind: input, shape index: {}]   ;;  %s200_s1 = inlined_call_operand.vmem [shape: f32[32,24], index: 1, kind: input, shape index: {}]   ;;  %s201_s2 = inlined_call_operand.vmem [shape: f32[1,24], index: 2, kind: input, shape index: {}]   ;;  %s202_s3 = inlined_call_operand.vmem [shape: f32[24,16], index: 3, kind: input, shape index: {}]   ;;  %s203_s4 = inlined_call_operand.vmem [shape: f32[1,16], index: 4, kind: input, shape index: {}]   ;;  %s204_s5 = inlined_call_operand.hbm [shape: f32[8,16], index: 5, kind: output, shape index: {}]  }
   0x1   :  { %v25_v0 = vld [vmem:[%s200_s1 + $0x18] sm:$0xff]  ;;  %v24_v1 = vld [vmem:[%s200_s1 + $0x10] sm:$0xff]  ;;  %v23_v2 = vld [vmem:[%s200_s1 + $0x8] sm:$0xff] }
   0x2   :  { %46 = vmatpush.msra.mxu0 %v25_v0 }
   0x3   :  { %10 = vsyncpa [#allocation3], 0  ;;  %v22_v3 = vld [vmem:[%s200_s1] sm:$0xff]  ;;  %vm30_vm0 = vcmask 261120   ;;  %v57_v5 = vld [vmem:[%s202_s3 + $0x10] sm:$0xff]  ;;  %vm62_vm1 = vcmask 195584  }
   0x4   :  { %47 = vmatpush.msra.mxu0 %v24_v1  ;;  %v21_v4 = vld [vmem:[%s199_s0] sm:$0xff]  ;;  %79 = vmatpush.msra.mxu1 %v57_v5  ;;  %v56_v6 = vld [vmem:[%s202_s3 + $0x8] sm:$0xff]  ;;  %s135_s11 = smov [#allocation2]   ;;  %vm86_vm2 = vcmask 130048  }
   0x5   :  { %v55_v7 = vld [vmem:[%s202_s3] sm:$0xff]  ;;  %s93_s12 = sshll.u32 %s135_s11, 4  ;;  %s95_s3 = sshll.u32 %s204_s5, 4  ;;  %s94_s12 = int_to_ptr.vmem [resolvable:$true] %s93_s12  ;;  %s96_s3 = int_to_ptr.hbm [resolvable:$true] %s95_s3 }
   0x6   :  { %48 = vmatpush.msra.mxu0 %v23_v2  ;;  %80 = vmatpush.msra.mxu1 %v56_v6  ;;  %v107_v8 = vld [vmem:[%s201_s2] ss:$0 sm:$0xff] }
   0x7   :  { %v108_v12 = vld [vmem:[%s203_s4] ss:$0 sm:$0xff] }
   0x8   :  { %49 = vmatpush.msra.mxu0 %v22_v3  ;;  %81 = vmatpush.msra.mxu1 %v55_v7 }
   0x9   :  { %104 = vmatmul.msk.f32.vlgmr.msra.gmra.mxu0 %vm30_vm0, %v21_v4 }
  0x86   :  { %v51_v9 = vpop.f32.mrf.mxu0 }
  0x87   :  { %v52_v10 = vadd.f32 %v107_v8, %v51_v9 }
  0x89   :  { %v54_v11 = vmax.f32 %v52_v10, 0.0 }
  0x8b   :  { %105 = vmatmul.msk.f32.vlgmr.msra.gmra.mxu1 %vm62_vm1, %v54_v11 }
 0x108   :  { %v83_v13 = vpop.f32.mrf.mxu1 }
 0x109   :  { %v84_v14 = vadd.f32 %v108_v12, %v83_v13 }
 0x10b   :  { %87 = vst.msk [vmem:[#allocation2] sm:$0xff] %vm86_vm2, %v84_v14 }
 0x10c   :  { %98 = dma.vmem_to_hbm [thread:$0]  %s94_s12, 128, %s96_s3, [#allocation3]  }
 0x10d   :  { %133 = dma.done.wait [#allocation3], 128  }
 0x10e   :  { %134 = vsyncadd [#allocation3], 4294967168 }
 0x10f   :  { %103 = vsyncpa [#allocation3], 1 }

</bundles_post_ra>
